<compile_context>
chip_gen: v7x
topology: tpu7x:2x2x1
jax: 0.10.0
libtpu: 0.0.40
codegen_flags: <defaults>
</compile_context>

<pallas_src>
import functools

import jax
import jax.numpy as jnp
from jax import lax
from jax.experimental import pallas as pl
from jax.experimental.pallas import tpu as pltpu

_BN_EPS = 1e-5
_VMEM_LIMIT = 32 * 1024 * 1024   # fits v5e/v6e/v7x; largest working set ~15 MiB


def _ru(x, m):
    return (x + m - 1) // m * m


def _cp(c):
    """Channel padding: at least 128 and a multiple of 128 (full lane width)."""
    return max(128, _ru(c, 128))


def _row_tile(m, cap=256):
    """(padded rows, row tile). 16-row (bf16 sublane) granularity."""
    mp = _ru(m, 16)
    if mp <= cap:
        return mp, mp
    for t in (512, 256, 128, 64, 32, 16):
        if t <= cap and mp % t == 0:
            return mp, t
    mp = _ru(mp, cap)
    return mp, cap


def _col_tile(n, cap=512):
    """(padded cols, col tile). Never narrower than 128 lanes."""
    np_ = _ru(n, 128)
    if np_ <= cap:
        return np_, np_
    if np_ % cap == 0:
        return np_, cap
    for t in (512, 384, 256, 128):
        if t <= cap and np_ % t == 0:
            return np_, t
    return _ru(np_, cap), cap


# ----------------------------------------------------------------------------
# Tiled matmul kernels (MXU), bf16 in / f32 accumulate.
# Grid = (N tiles, M tiles) with M innermost; weight tile resident across M.
# ----------------------------------------------------------------------------
def _mm_kernel(a_ref, b_ref, o_ref):
    o_ref[...] = jnp.dot(a_ref[...], b_ref[...],
                         preferred_element_type=jnp.float32).astype(o_ref.dtype)


def _mm_stats_kernel(a_ref, b_ref, o_ref, s_ref, q_ref):
    # Matmul + fused per-channel sum / sum-of-squares (BatchNorm statistics).
    y = jnp.dot(a_ref[...], b_ref[...], preferred_element_type=jnp.float32)
    o_ref[...] = y.astype(o_ref.dtype)

    @pl.when(pl.program_id(1) == 0)
    def _():
        s_ref[...] = jnp.zeros_like(s_ref)
        q_ref[...] = jnp.zeros_like(q_ref)

    s_ref[...] += jnp.sum(y, axis=0, keepdims=True)
    q_ref[...] += jnp.sum(y * y, axis=0, keepdims=True)


@functools.partial(jax.jit, static_argnames=("compute_stats", "out_dtype"))
def pallas_matmul(a, b, compute_stats=False, out_dtype=jnp.bfloat16):
    """a: (M, K), b: (K, N). Returns a @ b (and optional column sum/sumsq)."""
    M, K = a.shape
    K2, N = b.shape
    assert K == K2
    Mp, tm = _row_tile(M, cap=256)
    Np, tn = _col_tile(N, cap=512)

    a = a.astype(jnp.bfloat16)
    b = b.astype(jnp.bfloat16)
    if Mp != M:
        a = jnp.pad(a, ((0, Mp - M), (0, 0)))
    if Np != N:                       # never triggers: weights padded at init
        b = jnp.pad(b, ((0, 0), (0, Np - N)))

    grid = (Np // tn, Mp // tm)       # j (weights) outer, i (rows) inner
    a_spec = pl.BlockSpec((tm, K), lambda j, i: (i, 0))
    b_spec = pl.BlockSpec((K, tn), lambda j, i: (0, j))   # resident across i
    o_spec = pl.BlockSpec((tm, tn), lambda j, i: (i, j))

    if compute_stats:
        out_shape = (jax.ShapeDtypeStruct((Mp, Np), out_dtype),
                     jax.ShapeDtypeStruct((1, Np), jnp.float32),
                     jax.ShapeDtypeStruct((1, Np), jnp.float32))
        out_specs = (o_spec,
                     pl.BlockSpec((1, tn), lambda j, i: (0, j)),
                     pl.BlockSpec((1, tn), lambda j, i: (0, j)))
        o, s, q = pl.pallas_call(
            _mm_stats_kernel,
            out_shape=out_shape,
            grid=grid,
            in_specs=[a_spec, b_spec],
            out_specs=out_specs,
            compiler_params=pltpu.CompilerParams(
                dimension_semantics=("parallel", "arbitrary"),
                vmem_limit_bytes=_VMEM_LIMIT),
        )(a, b)
        return o[:M, :N], s[0, :N], q[0, :N]

    o = pl.pallas_call(
        _mm_kernel,
        out_shape=jax.ShapeDtypeStruct((Mp, Np), out_dtype),
        grid=grid,
        in_specs=[a_spec, b_spec],
        out_specs=o_spec,
        compiler_params=pltpu.CompilerParams(
            dimension_semantics=("parallel", "parallel"),
            vmem_limit_bytes=_VMEM_LIMIT),
    )(a, b)
    return o[:M, :N]


# ----------------------------------------------------------------------------
# Fused BatchNorm apply (+ residual) (+ ReLU) — single FMA, bf16 in/out.
# scale/bias are precomputed per channel in glue (2 broadcast operands only).
# ----------------------------------------------------------------------------
def _make_bn_kernel(relu, has_res):
    if has_res:
        def kernel(y_ref, s_ref, b_ref, r_ref, o_ref):
            out = y_ref[...].astype(jnp.float32) * s_ref[...] + b_ref[...]
            out = out + r_ref[...].astype(jnp.float32)
            if relu:
                out = jnp.maximum(out, 0.0)
            o_ref[...] = out.astype(o_ref.dtype)
    else:
        def kernel(y_ref, s_ref, b_ref, o_ref):
            out = y_ref[...].astype(jnp.float32) * s_ref[...] + b_ref[...]
            if relu:
                out = jnp.maximum(out, 0.0)
            o_ref[...] = out.astype(o_ref.dtype)
    return kernel


_BN_KERNELS = {(r, h): _make_bn_kernel(r, h)
               for r in (False, True) for h in (False, True)}


@functools.partial(jax.jit, static_argnames=("relu",))
def pallas_bn_act(y, scale, bias, residual=None, relu=True):
    M, C = y.shape
    Mp, tm = _row_tile(M, cap=512)
    if Mp != M:
        y = jnp.pad(y, ((0, Mp - M), (0, 0)))
    has_res = residual is not None

    args = [y, scale.reshape(1, C).astype(jnp.float32),
            bias.reshape(1, C).astype(jnp.float32)]
    in_specs = [pl.BlockSpec((tm, C), lambda i: (i, 0)),
                pl.BlockSpec((1, C), lambda i: (0, 0)),
                pl.BlockSpec((1, C), lambda i: (0, 0))]
    if has_res:
        r = residual if Mp == M else jnp.pad(residual, ((0, Mp - M), (0, 0)))
        args.append(r)
        in_specs.append(pl.BlockSpec((tm, C), lambda i: (i, 0)))

    out = pl.pallas_call(
        _BN_KERNELS[(relu, has_res)],
        out_shape=jax.ShapeDtypeStruct((Mp, C), jnp.bfloat16),
        grid=(Mp // tm,),
        in_specs=in_specs,
        out_specs=pl.BlockSpec((tm, C), lambda i: (i, 0)),
        compiler_params=pltpu.CompilerParams(
            dimension_semantics=("parallel",),
            vmem_limit_bytes=_VMEM_LIMIT),
    )(*args)
    return out[:M]


# ----------------------------------------------------------------------------
# MaxPool2d (3x3, stride 2, padding 1) — single-pass even/odd kernel.
# The padded input is split in glue into 4 parity planes (even/odd rows x
# even/odd cols); every 3x3/stride-2 tap is then a contiguous static slice.
# ----------------------------------------------------------------------------
def _maxpool_eo_kernel(ee_ref, eo_ref, oe_ref, oo_ref, o_ref):
    Ho, Wo = o_ref.shape[1], o_ref.shape[2]
    ee = ee_ref[...]
    eo = eo_ref[...]
    oe = oe_ref[...]
    oo = oo_ref[...]

    def w(a, ry, rx):
        return a[:, ry:ry + Ho, rx:rx + Wo, :]

    # taps (ky,kx): parity (ky%2,kx%2), offset (ky//2,kx//2)
    m = jnp.maximum(jnp.maximum(jnp.maximum(w(ee, 0, 0), w(eo, 0, 0)),
                                jnp.maximum(w(ee, 0, 1), w(oe, 0, 0))),
                    jnp.maximum(jnp.maximum(w(oo, 0, 0), w(oe, 0, 1)),
                                jnp.maximum(w(ee, 1, 0), w(eo, 1, 0))))
    o_ref[...] = jnp.maximum(m, w(ee, 1, 1)).astype(o_ref.dtype)


@jax.jit
def maxpool2d_3x3s2(x):
    N, H, W, C = x.shape
    Ho = (H + 2 - 3) // 2 + 1
    Wo = (W + 2 - 3) // 2 + 1
    xp = jnp.pad(x, ((0, 0), (1, 1), (1, 1), (0, 0)),
                 constant_values=-jnp.inf)
    ee = xp[:, 0::2, 0::2, :]
    eo = xp[:, 0::2, 1::2, :]
    oe = xp[:, 1::2, 0::2, :]
    oo = xp[:, 1::2, 1::2, :]

    def spec(arr):
        return pl.BlockSpec((1,) + arr.shape[1:], lambda n: (n, 0, 0, 0))

    out = pl.pallas_call(
        _maxpool_eo_kernel,
        out_shape=jax.ShapeDtypeStruct((N, Ho, Wo, C), jnp.bfloat16),
        grid=(N,),
        in_specs=[spec(ee), spec(eo), spec(oe), spec(oo)],
        out_specs=pl.BlockSpec((1, Ho, Wo, C), lambda n: (n, 0, 0, 0)),
        compiler_params=pltpu.CompilerParams(
            dimension_semantics=("parallel",)),
    )(ee, eo, oe, oo)
    return out


# ----------------------------------------------------------------------------
# AdaptiveAvgPool2d((1,1)) — per-image spatial mean kernel (f32 accumulate)
# ----------------------------------------------------------------------------
def _avgpool_kernel(x_ref, o_ref):
    o_ref[...] = jnp.mean(x_ref[...].astype(jnp.float32), axis=1, keepdims=True)


@jax.jit
def pallas_global_avgpool(x):
    N, H, W, C = x.shape
    xr = x.reshape(N, H * W, C)
    out = pl.pallas_call(
        _avgpool_kernel,
        out_shape=jax.ShapeDtypeStruct((N, 1, C), jnp.float32),
        grid=(N,),
        in_specs=[pl.BlockSpec((1, H * W, C), lambda n: (n, 0, 0))],
        out_specs=pl.BlockSpec((1, 1, C), lambda n: (n, 0, 0)),
        compiler_params=pltpu.CompilerParams(
            dimension_semantics=("parallel",)),
    )(xr)
    return out.reshape(N, C)


# ----------------------------------------------------------------------------
# Convolution = (reshape for 1x1 | im2col glue for KxK) + fused stats matmul
# ----------------------------------------------------------------------------
@functools.partial(jax.jit, static_argnames=("kh", "kw", "stride", "padding"))
def conv2d_stats(x, wm, kh, kw, stride, padding):
    """x: (N,H,W,Cin) bf16; wm: (K, Cout) bf16 with K = ru(kh*kw*Cin, 16).
    Returns bf16 conv output (N,Ho,Wo,Cout) + per-channel sum / sum-of-squares."""
    N, H, W, Cin = x.shape
    K, Cout = wm.shape
    Ho = (H + 2 * padding - kh) // stride + 1
    Wo = (W + 2 * padding - kw) // stride + 1
    if kh == 1 and kw == 1 and padding == 0:
        xs = x[:, ::stride, ::stride, :] if stride > 1 else x
        a = xs.reshape(N * Ho * Wo, Cin)
    else:
        xp = jnp.pad(x, ((0, 0), (padding, padding), (padding, padding), (0, 0)))
        cols = []
        for ky in range(kh):
            for kx in range(kw):
                cols.append(xp[:, ky:ky + (Ho - 1) * stride + 1:stride,
                                kx:kx + (Wo - 1) * stride + 1:stride, :])
        extra = K - kh * kw * Cin          # K padding (e.g. stem 147 -> 160)
        if extra > 0:
            cols.append(jnp.zeros((N, Ho, Wo, extra), x.dtype))
        a = jnp.concatenate(cols, axis=-1).reshape(N * Ho * Wo, K)
    assert a.shape[1] == K
    y, s, q = pallas_matmul(a, wm, compute_stats=True, out_dtype=jnp.bfloat16)
    return y.reshape(N, Ho, Wo, Cout), s, q


def conv_bn(x, wm, gamma, beta, *, kh, kw, stride, padding,
            residual=None, relu=True):
    """Conv (bias=False) + training-mode BatchNorm (+residual) (+ReLU)."""
    y, s, q = conv2d_stats(x, wm, kh=kh, kw=kw, stride=stride, padding=padding)
    N, Ho, Wo, C = y.shape
    M = N * Ho * Wo
    mean = s / M
    # NOTE: E[x^2]-E[x]^2 in f32; adequate here, Welford would be safer generally.
    var = jnp.maximum(q / M - mean * mean, 0.0)
    scale = gamma * lax.rsqrt(var + _BN_EPS)
    bias = beta - mean * scale
    r = None if residual is None else residual.reshape(M, C)
    out = pallas_bn_act(y.reshape(M, C), scale, bias, r, relu=relu)
    return out.reshape(N, Ho, Wo, C)


# ----------------------------------------------------------------------------
# Model definition (parameters + forward)
# ----------------------------------------------------------------------------
def conv_w_matrix(key, cout, cin, kh, kw, cin_pad=None, cout_pad=None):
    """torch (Cout,Cin,KH,KW) init -> (ru(KH*KW*Cin_pad,16), Cout_pad) bf16 matrix.
    Padding (zero rows/cols) is done ONCE here, matching (ky,kx,cin) im2col order."""
    cin_p = cin if cin_pad is None else cin_pad
    cout_p = cout if cout_pad is None else cout_pad
    fan_in = cin * kh * kw
    w = jax.random.normal(key, (cout, cin, kh, kw), dtype=jnp.float32) * \
        jnp.sqrt(2.0 / fan_in)
    w = jnp.transpose(w, (2, 3, 1, 0))                       # (kh,kw,cin,cout)
    w = jnp.pad(w, ((0, 0), (0, 0), (0, cin_p - cin), (0, cout_p - cout)))
    wm = w.reshape(kh * kw * cin_p, cout_p)
    K = kh * kw * cin_p
    Kp = _ru(K, 16)
    if Kp != K:
        wm = jnp.pad(wm, ((0, Kp - K), (0, 0)))
    return wm.astype(jnp.bfloat16)


def bn_param_vectors(c, c_pad):
    # gamma=0 on padded channels -> scale=0 -> padded channels stay exactly 0.
    g = jnp.concatenate([jnp.ones((c,), jnp.float32),
                         jnp.zeros((c_pad - c,), jnp.float32)])
    b = jnp.zeros((c_pad,), jnp.float32)
    return g, b


def init_bottleneck(key, cin, cout, cmid, stride):
    ks = jax.random.split(key, 4)
    cin_p, cout_p, cmid_p = _cp(cin), _cp(cout), _cp(cmid)
    g1, b1 = bn_param_vectors(cmid, cmid_p)
    g2, b2 = bn_param_vectors(cmid, cmid_p)
    g3, b3 = bn_param_vectors(cout, cout_p)
    p = {
        "stride": stride,
        "w1": conv_w_matrix(ks[0], cmid, cin, 1, 1, cin_pad=cin_p, cout_pad=cmid_p),
        "g1": g1, "b1": b1,
        "w2": conv_w_matrix(ks[1], cmid, cmid, 3, 3, cin_pad=cmid_p, cout_pad=cmid_p),
        "g2": g2, "b2": b2,
        "w3": conv_w_matrix(ks[2], cout, cmid, 1, 1, cin_pad=cmid_p, cout_pad=cout_p),
        "g3": g3, "b3": b3,
    }
    if cin != cout:
        p["wr"] = conv_w_matrix(ks[3], cout, cin, 1, 1, cin_pad=cin_p, cout_pad=cout_p)
        p["gr"], p["br"] = bn_param_vectors(cout, cout_p)
    return p


def init_resnet50(key, num_classes):
    keys = jax.random.split(key, 20)
    params = {
        "init_w": conv_w_matrix(keys[0], 64, 3, 7, 7, cin_pad=3, cout_pad=_cp(64)),
    }
    params["init_g"], params["init_b"] = bn_param_vectors(64, _cp(64))
    cfg = [
        [(64, 256, 64, 1), (256, 256, 64, 1), (256, 256, 64, 1)],
        [(256, 512, 128, 2)] + [(512, 512, 128, 1)] * 3,
        [(512, 1024, 256, 2)] + [(1024, 1024, 256, 1)] * 5,
        [(1024, 2048, 512, 2)] + [(2048, 2048, 512, 1)] * 2,
    ]
    stages = []
    ki = 1
    for stage_cfg in cfg:
        blocks = []
        for (cin, cout, cmid, s) in stage_cfg:
            blocks.append(init_bottleneck(keys[ki], cin, cout, cmid, s))
            ki += 1
        stages.append(blocks)
    params["stages"] = stages
    nc_pad = _ru(max(num_classes, 1), 128)        # >=128 output lanes for the FC
    fc_w = jax.random.normal(keys[ki], (num_classes, 2048), dtype=jnp.float32) * 0.02
    params["fc_w"] = jnp.pad(fc_w.T, ((0, 0), (0, nc_pad - num_classes))) \
        .astype(jnp.bfloat16)                     # (2048, nc_pad)
    params["fc_b"] = jnp.zeros((num_classes,), jnp.float32)
    params["num_classes"] = num_classes
    return params


def bottleneck_forward(x, p):
    s = p["stride"]
    out = conv_bn(x, p["w1"], p["g1"], p["b1"], kh=1, kw=1, stride=1, padding=0,
                  relu=True)
    out = conv_bn(out, p["w2"], p["g2"], p["b2"], kh=3, kw=3, stride=s, padding=1,
                  relu=True)
    if "wr" in p:
        res = conv_bn(x, p["wr"], p["gr"], p["br"], kh=1, kw=1, stride=s, padding=0,
                      relu=False)
    else:
        res = x
    # bn3 + residual add + relu fused in one Pallas elementwise kernel
    out = conv_bn(out, p["w3"], p["g3"], p["b3"], kh=1, kw=1, stride=1, padding=0,
                  residual=res, relu=True)
    return out


def resnet50_forward(params, x_nchw):
    # PyTorch NCHW f32 -> NHWC bf16
    x = jnp.transpose(x_nchw, (0, 2, 3, 1)).astype(jnp.bfloat16)
    out = conv_bn(x, params["init_w"], params["init_g"], params["init_b"],
                  kh=7, kw=7, stride=2, padding=3, relu=True)
    out = maxpool2d_3x3s2(out)
    for blocks in params["stages"]:
        for p in blocks:
            out = bottleneck_forward(out, p)
    pooled = pallas_global_avgpool(out)                     # (N, 2048) f32
    logits_p = pallas_matmul(pooled, params["fc_w"],
                             compute_stats=False, out_dtype=jnp.float32)
    nc = params["num_classes"]
    logits = logits_p[:, :nc] + params["fc_b"][None, :]
    return logits


if __name__ == "__main__":
    key = jax.random.PRNGKey(0)
    pkey, xkey = jax.random.split(key)
    num_classes = 10
    params = init_resnet50(pkey, num_classes)
    # Small input consistent with the module: batch=2, 3 channels, 32x32 spatial (NCHW).
    x = jax.random.normal(xkey, (2, 3, 32, 32), dtype=jnp.float32)
    logits = resnet50_forward(params, x)
    logits = jax.block_until_ready(logits)
    assert logits.shape == (2, num_classes)
    assert bool(jnp.all(jnp.isfinite(logits)))
    print("KERNEL_OK")
</pallas_src>

<mosaic_0001>
module attributes {stable_mosaic.version = 11 : i64} {
  func.func @_mm_stats_kernel(%arg0: i32, %arg1: i32, %arg2: memref<256x160xbf16, #tpu.memory_space<vmem>>, %arg3: memref<160x128xbf16, #tpu.memory_space<vmem>>, %arg4: memref<256x128xbf16, #tpu.memory_space<vmem>>, %arg5: memref<1x128xf32, #tpu.memory_space<vmem>>, %arg6: memref<1x128xf32, #tpu.memory_space<vmem>>) attributes {dimension_semantics = [#tpu.dimension_semantics<parallel>, #tpu.dimension_semantics<arbitrary>], iteration_bounds = array<i64: 1, 2>, scalar_prefetch = 0 : i64, scratch_operands = 0 : i64, tpu.core_type = #tpu.core_type<tc>, window_params = [{transform_indices = @transform_0, window_bounds = array<i64: 256, 160>}, {transform_indices = @transform_1, window_bounds = array<i64: 160, 128>}, {transform_indices = @transform_2, window_bounds = array<i64: 256, 128>}, {transform_indices = @transform_3, window_bounds = array<i64: 1, 128>}, {transform_indices = @transform_4, window_bounds = array<i64: 1, 128>}]} {
    %c0 = arith.constant 0 : index
    %c0_0 = arith.constant 0 : index
    %0 = vector.load %arg2[%c0, %c0_0] : memref<256x160xbf16, #tpu.memory_space<vmem>>, vector<256x160xbf16>
    %c0_1 = arith.constant 0 : index
    %c0_2 = arith.constant 0 : index
    %1 = vector.load %arg3[%c0_1, %c0_2] : memref<160x128xbf16, #tpu.memory_space<vmem>>, vector<160x128xbf16>
    %cst = arith.constant dense<0.000000e+00> : vector<256x128xf32>
    %2 = tpu.matmul %0, %1, %cst {dimension_numbers = #tpu.dot_dimension_numbers<[1], [0], [0], [1], [0, 0, 1, 1], [], []>} : vector<256x160xbf16>, vector<160x128xbf16>, vector<256x128xf32> -> vector<256x128xf32>
    %3 = arith.truncf %2 : vector<256x128xf32> to vector<256x128xbf16>
    %c0_3 = arith.constant 0 : index
    %c0_4 = arith.constant 0 : index
    %4 = vector.load %arg4[%c0_3, %c0_4] : memref<256x128xbf16, #tpu.memory_space<vmem>>, vector<256x128xbf16>
    tpu.vector_store %arg4[%c0_3, %c0_4], %3 {strides = array<i32>} : memref<256x128xbf16, #tpu.memory_space<vmem>>, vector<256x128xbf16>,
    %c0_i32 = arith.constant 0 : i32
    %5 = arith.cmpi eq, %arg1, %c0_i32 : i32
    %6 = arith.extui %5 : i1 to i32
    %c0_i32_5 = arith.constant 0 : i32
    %7 = arith.cmpi ne, %6, %c0_i32_5 : i32
    scf.if %7 {
      %cst_16 = arith.constant 0.000000e+00 : f32
      %19 = vector.broadcast %cst_16 : f32 to vector<1x128xf32>
      %c0_17 = arith.constant 0 : index
      %c0_18 = arith.constant 0 : index
      %20 = vector.load %arg5[%c0_17, %c0_18] : memref<1x128xf32, #tpu.memory_space<vmem>>, vector<1x128xf32>
      tpu.vector_store %arg5[%c0_17, %c0_18], %19 {strides = array<i32>} : memref<1x128xf32, #tpu.memory_space<vmem>>, vector<1x128xf32>,
      %cst_19 = arith.constant 0.000000e+00 : f32
      %21 = vector.broadcast %cst_19 : f32 to vector<1x128xf32>
      %c0_20 = arith.constant 0 : index
      %c0_21 = arith.constant 0 : index
      %22 = vector.load %arg6[%c0_20, %c0_21] : memref<1x128xf32, #tpu.memory_space<vmem>>, vector<1x128xf32>
      tpu.vector_store %arg6[%c0_20, %c0_21], %21 {strides = array<i32>} : memref<1x128xf32, #tpu.memory_space<vmem>>, vector<1x128xf32>,
    } else {
    }
    %c0_6 = arith.constant 0 : index
    %c0_7 = arith.constant 0 : index
    %8 = vector.load %arg5[%c0_6, %c0_7] : memref<1x128xf32, #tpu.memory_space<vmem>>, vector<1x128xf32>
    %cst_8 = arith.constant dense<0.000000e+00> : vector<128xf32>
    %9 = vector.multi_reduction <add>, %2, %cst_8 [0] : vector<256x128xf32> to vector<128xf32>
    %10 = vector.shape_cast %9 : vector<128xf32> to vector<1x128xf32>
    %11 = arith.addf %8, %10 : vector<1x128xf32>
    %c0_9 = arith.constant 0 : index
    %c0_10 = arith.constant 0 : index
    %12 = vector.load %arg5[%c0_9, %c0_10] : memref<1x128xf32, #tpu.memory_space<vmem>>, vector<1x128xf32>
    tpu.vector_store %arg5[%c0_9, %c0_10], %11 {strides = array<i32>} : memref<1x128xf32, #tpu.memory_space<vmem>>, vector<1x128xf32>,
    %c0_11 = arith.constant 0 : index
    %c0_12 = arith.constant 0 : index
    %13 = vector.load %arg6[%c0_11, %c0_12] : memref<1x128xf32, #tpu.memory_space<vmem>>, vector<1x128xf32>
    %14 = arith.mulf %2, %2 : vector<256x128xf32>
    %cst_13 = arith.constant dense<0.000000e+00> : vector<128xf32>
    %15 = vector.multi_reduction <add>, %14, %cst_13 [0] : vector<256x128xf32> to vector<128xf32>
    %16 = vector.shape_cast %15 : vector<128xf32> to vector<1x128xf32>
    %17 = arith.addf %13, %16 : vector<1x128xf32>
    %c0_14 = arith.constant 0 : index
    %c0_15 = arith.constant 0 : index
    %18 = vector.load %arg6[%c0_14, %c0_15] : memref<1x128xf32, #tpu.memory_space<vmem>>, vector<1x128xf32>
    tpu.vector_store %arg6[%c0_14, %c0_15], %17 {strides = array<i32>} : memref<1x128xf32, #tpu.memory_space<vmem>>, vector<1x128xf32>,
    return
  }
  func.func @transform_0(%arg0: i32, %arg1: i32) -> (i32, i32) {
    %c0_i32 = arith.constant 0 : i32
    %c0_i32_0 = arith.constant 0 : i32
    return %arg1, %c0_i32 : i32, i32
  }
  func.func @transform_1(%arg0: i32, %arg1: i32) -> (i32, i32) {
    %c0_i32 = arith.constant 0 : i32
    %c0_i32_0 = arith.constant 0 : i32
    return %c0_i32, %arg0 : i32, i32
  }
  func.func @transform_2(%arg0: i32, %arg1: i32) -> (i32, i32) {
    %c0_i32 = arith.constant 0 : i32
    return %arg1, %arg0 : i32, i32
  }
  func.func @transform_3(%arg0: i32, %arg1: i32) -> (i32, i32) {
    %c0_i32 = arith.constant 0 : i32
    %c0_i32_0 = arith.constant 0 : i32
    return %c0_i32, %arg0 : i32, i32
  }
  func.func @transform_4(%arg0: i32, %arg1: i32) -> (i32, i32) {
    %c0_i32 = arith.constant 0 : i32
    %c0_i32_0 = arith.constant 0 : i32
    return %c0_i32, %arg0 : i32, i32
  }
}

</mosaic_0001>

<bundles_post_ra>
// kernel: pallas_matmul.1
= control target key start
LH: loop header
LB: loop body
LE: loop exit
PB: predicated region body
PF: predicated region fallthrough
CT: control target
= control target key end

     0   :  { %10 = vsyncpa [#allocation3], 0  ;;  %s2151_s0 = inlined_call_operand.vmem [shape: bf16[512,160], index: 0, kind: input, shape index: {}]   ;;  %s2152_s1 = inlined_call_operand.vmem [shape: bf16[160,128], index: 1, kind: input, shape index: {}]   ;;  %s2153_s2 = inlined_call_operand.hbm [shape: bf16[512,128], index: 2, kind: output, shape index: {0}]   ;;  %s2154_s3 = inlined_call_operand.hbm [shape: f32[1,128], index: 3, kind: output, shape index: {1}]   ;;  %s2155_s4 = inlined_call_operand.hbm [shape: f32[1,128], index: 4, kind: output, shape index: {2}]  }
   0x1   :  { %12 = vsyncpa [#allocation3 + $0x1], 0 }
   0x2   :  { %13 = vsyncpa [#allocation5], 0  ;;  %s1695_s15 = smov 0   ;;  %s1697_s16 = smov 0  }
   0x3   :  { %s1699_s17 = smov 0   ;;  %s1701_s18 = smov 0  }
   0x4   :  { %s1703_s19 = smov 0   ;;  %s1705_s20 = smov 0  }
   0x5 LB: > { %s1137_s21 = sadd.s32 4294967295, %s1661_s20   ;;  %s1138_s22 = sadd.s32 4294967294, %s1661_s20   ;;  %s1661_s20 = sphi %s1705_s20, %s19_s20   ;;  %s1657_s19 = sphi %s1703_s19, %s2163_s19   ;;  %s1653_s18 = sphi %s1701_s18, %s2162_s18   ;;  %s1649_s17 = sphi %s1699_s17, %s2161_s17   ;;  %s1645_s16 = sphi %s1697_s16, %s2160_s16   ;;  %s1641_s15 = sphi %s1695_s15, %s2159_s15  }
   0x6   : > { %s28_s23 = sadd.s32 1, %s1657_s19  ;;  %s92_s24 = sadd.s32 1, %s1649_s17 }
   0x7   : > { %p29_p0 = scmp.ge.s32.totalorder %s28_s23, 2  ;;  %p102_p1 = scmp.ne.s32.totalorder %s1649_s17, %s1645_s16 }
   0x8   : > { %p1731_p2 = scmp.eq.s32.totalorder %s1137_s21, 1  ;;  %p108_p3 = scmp.ne.s32.totalorder %s1645_s16, %s1641_s15 }
   0x9   : > { %s2165_s23 = smov (%p29_p0, %s28_s23), 0  ;;  %p109_p5 = scmp.eq.s32.totalorder %s1138_s22, 1 }
   0xa   : > { %p1741_p4 = por %p1731_p2, %p102_p1  ;;  %s87_s27 = ssub.s32 %s1657_s19, %s2165_s23 }
   0xb   : > { %p1142_p6 = scmp.ge.s32.totalorder %s1661_s20, 1  ;;  %p90_p7 = scmp.eq.s32.totalorder %s87_s27, 0 }
   0xc   : > { %p1748_p8 = por %p109_p5, %p108_p3  ;;  %p196_p9 = scmp.lt.s32.totalorder %s1661_s20, 3 }
   0xd   : > { %s1754_s29 = scalar_select %p90_p7, %s1649_s17, %s92_s24  }
   0xe   : > { %p197_p10 = pnand %p1142_p6, %p196_p9 }
   0xf   : > { %v1469_v0 = vld [vmem:[%s2152_s1] sm:$0xff] (!%p197_p10)   ;;  %v1663_v1 = vmov (!%p197_p10), 0   ;;  %s1144_s6 = sshll.u32 (!%p197_p10), %s1653_s18, 5  ;;  %v1470_v2 = vld [vmem:[%s2152_s1 + $0x8] sm:$0xff] (!%p197_p10)   ;;  %v1471_v3 = vld [vmem:[%s2152_s1 + $0x10] sm:$0xff] (!%p197_p10)   ;;  %vm496_vm0 = vcmask (!%p197_p10), 261120  }
  0x10   : > { %200 = sbr.rel (%p197_p10) target bundleno = 458 (0x1ca), region = 28  ;;  %545 = vmatprep.subr.bf16.mxu0 (!%p197_p10), %v1663_v1  ;;  %1376 = vmatprep.subr.bf16.mxu1 (!%p197_p10), %v1663_v1  ;;  %p228_p11 = scmp.lt.s32.totalorder (!%p197_p10), %s1144_s6, 63  ;;  %v1472_v4 = vld [vmem:[%s2152_s1 + $0x18] sm:$0xff] (!%p197_p10)   ;;  %v1473_v7 = vld [vmem:[%s2152_s1 + $0x20] sm:$0xff] (!%p197_p10)   ;;  %v1474_v8 = vld [vmem:[%s2152_s1 + $0x28] sm:$0xff] (!%p197_p10)  }
  0x11   : > { %546 = vmatpush1.bf16.msra.mxu0 (!%p197_p10), %v1469_v0  ;;  %1386 = vmatpush1.bf16.msra.mxu1 (!%p197_p10), %v1469_v0  ;;  %v1475_v9 = vld [vmem:[%s2152_s1 + $0x30] sm:$0xff] (!%p197_p10)   ;;  %v1476_v10 = vld [vmem:[%s2152_s1 + $0x38] sm:$0xff] (!%p197_p10)   ;;  %v1477_v11 = vld [vmem:[%s2152_s1 + $0x40] sm:$0xff] (!%p197_p10)   ;;  %s220_s21 = sand.u32 (!%p197_p10), 1, %s1645_s16   ;;  %p1237_p12 = scmp.ne.s32.totalorder (!%p197_p10), %s1653_s18, 0 }
  0x12   : > { %547 = vmatprep.subr.bf16.mxu0 (!%p197_p10), %v1663_v1  ;;  %1377 = vmatprep.subr.bf16.mxu1 (!%p197_p10), %v1663_v1  ;;  %v1478_v12 = vld [vmem:[%s2152_s1 + $0x48] sm:$0xff] (!%p197_p10)   ;;  %s1143_s22 = sshll.u32 (!%p197_p10), %s220_s21, 7 }
  0x15   : > { %548 = vmatpush1.bf16.msra.mxu0 (!%p197_p10), %v1470_v2  ;;  %1387 = vmatpush1.bf16.msra.mxu1 (!%p197_p10), %v1470_v2 }
  0x16   : > { %549 = vmatprep.subr.bf16.mxu0 (!%p197_p10), %v1663_v1  ;;  %1378 = vmatprep.subr.bf16.mxu1 (!%p197_p10), %v1663_v1 }
  0x17   : > { %s2167_s6 = smov (!%p228_p11, %s1144_s6), 63 }
  0x18   : > { %s1247_s11 = sshll.u32 %s2167_s6, 3 }
  0x19   : > { %s1769_s14 = scalar_lea.vmem %s2151_s0, %s1247_s11  ;;  %550 = vmatpush1.bf16.msra.mxu0 %v1471_v3  ;;  %1388 = vmatpush1.bf16.msra.mxu1 %v1471_v3 }
  0x1a   : > { %551 = vmatprep.subr.bf16.mxu0 %v1663_v1  ;;  %1379 = vmatprep.subr.bf16.mxu1 %v1663_v1  ;;  %v1481_v5 = vld [vmem:[%s1769_s14 + $0x4] ss:$8 sps:$4 sm:$0xff]   ;;  %v1479_v13 = vld [vmem:[%s1769_s14] ss:$8 sps:$4 sm:$0xff]   ;;  %v1485_v15 = vld [vmem:[%s1769_s14 + $0x14] ss:$8 sps:$4 sm:$0xff]  }
  0x1b   : > { %v1484_v6 = vld [vmem:[%s1769_s14 + $0x84] ss:$8 sps:$4 sm:$0xff]   ;;  %1189 = vmatprep.mubr.msk.bf16.mxu0 %vm496_vm0, %v1481_v5  ;;  %v1482_v14 = vld [vmem:[%s1769_s14 + $0x80] ss:$8 sps:$4 sm:$0xff]   ;;  %v1487_v16 = vld [vmem:[%s1769_s14 + $0x94] ss:$8 sps:$4 sm:$0xff]  }
  0x1c   : > { %1197 = vmatprep.mubr.msk.bf16.mxu1 %vm496_vm0, %v1484_v6  ;;  %v1489_v17 = vld [vmem:[%s1769_s14 + $0x10] ss:$8 sps:$4 sm:$0xff]   ;;  %v1491_v19 = vld [vmem:[%s1769_s14 + $0x24] ss:$8 sps:$4 sm:$0xff]   ;;  %v1495_v21 = vld [vmem:[%s1769_s14 + $0x20] ss:$8 sps:$4 sm:$0xff]  }
  0x1d   : > { %552 = vmatpush1.bf16.msra.mxu0 %v1472_v4  ;;  %1389 = vmatpush1.bf16.msra.mxu1 %v1472_v4  ;;  %v1490_v18 = vld [vmem:[%s1769_s14 + $0x90] ss:$8 sps:$4 sm:$0xff]   ;;  %v1493_v20 = vld [vmem:[%s1769_s14 + $0xa4] ss:$8 sps:$4 sm:$0xff]   ;;  %v1496_v22 = vld [vmem:[%s1769_s14 + $0xa0] ss:$8 sps:$4 sm:$0xff]  }
  0x1e   : > { %553 = vmatprep.subr.bf16.mxu0 %v1663_v1  ;;  %1380 = vmatprep.subr.bf16.mxu1 %v1663_v1  ;;  %v1497_v23 = vld [vmem:[%s1769_s14 + $0x34] ss:$8 sps:$4 sm:$0xff]   ;;  %v1501_v25 = vld [vmem:[%s1769_s14 + $0x30] ss:$8 sps:$4 sm:$0xff]   ;;  %v1503_v27 = vld [vmem:[%s1769_s14 + $0x44] ss:$8 sps:$4 sm:$0xff]  }
  0x1f   : > { %v1499_v24 = vld [vmem:[%s1769_s14 + $0xb4] ss:$8 sps:$4 sm:$0xff]   ;;  %v1502_v26 = vld [vmem:[%s1769_s14 + $0xb0] ss:$8 sps:$4 sm:$0xff]   ;;  %v1505_v28 = vld [vmem:[%s1769_s14 + $0xc4] ss:$8 sps:$4 sm:$0xff]  }
  0x20   : > { %v1507_v29 = vld [vmem:[%s1769_s14 + $0x40] ss:$8 sps:$4 sm:$0xff]   ;;  %v1509_v31 = vld [vmem:[%s1769_s14 + $0x54] ss:$8 sps:$4 sm:$0xff]   ;;  %v1513_v33 = vld [vmem:[%s1769_s14 + $0x50] ss:$8 sps:$4 sm:$0xff]  }
  0x21   : > { %554 = vmatpush1.bf16.msra.mxu0 %v1473_v7  ;;  %1390 = vmatpush1.bf16.msra.mxu1 %v1473_v7  ;;  %v1508_v30 = vld [vmem:[%s1769_s14 + $0xc0] ss:$8 sps:$4 sm:$0xff]   ;;  %v1511_v32 = vld [vmem:[%s1769_s14 + $0xd4] ss:$8 sps:$4 sm:$0xff]   ;;  %v1514_v34 = vld [vmem:[%s1769_s14 + $0xd0] ss:$8 sps:$4 sm:$0xff]  }
  0x22   : > { %555 = vmatprep.subr.bf16.mxu0 %v1663_v1  ;;  %1381 = vmatprep.subr.bf16.mxu1 %v1663_v1  ;;  %v1515_v35 = vld [vmem:[%s1769_s14 + $0x64] ss:$8 sps:$4 sm:$0xff]   ;;  %v1519_v37 = vld [vmem:[%s1769_s14 + $0x60] ss:$8 sps:$4 sm:$0xff]   ;;  %v1521_v39 = vld [vmem:[%s1769_s14 + $0x74] ss:$8 sps:$4 sm:$0xff]  }
  0x23   : > { %v1517_v36 = vld [vmem:[%s1769_s14 + $0xe4] ss:$8 sps:$4 sm:$0xff]   ;;  %v1520_v38 = vld [vmem:[%s1769_s14 + $0xe0] ss:$8 sps:$4 sm:$0xff]   ;;  %v1523_v40 = vld [vmem:[%s1769_s14 + $0xf4] ss:$8 sps:$4 sm:$0xff]  }
  0x24   : > { %v1525_v41 = vld [vmem:[%s1769_s14 + $0x70] ss:$8 sps:$4 sm:$0xff]  }
  0x25   : > { %556 = vmatpush1.bf16.msra.mxu0 %v1474_v8  ;;  %1391 = vmatpush1.bf16.msra.mxu1 %v1474_v8  ;;  %v1526_v42 = vld [vmem:[%s1769_s14 + $0xf0] ss:$8 sps:$4 sm:$0xff]   ;;  %s1855_s14 = scalar_lea.vmem [#allocation2], %s1143_s22 }
  0x26   : > { %557 = vmatprep.subr.bf16.mxu0 %v1663_v1  ;;  %1382 = vmatprep.subr.bf16.mxu1 %v1663_v1 }
  0x29   : > { %558 = vmatpush1.bf16.msra.mxu0 %v1475_v9  ;;  %1392 = vmatpush1.bf16.msra.mxu1 %v1475_v9 }
  0x2a   : > { %559 = vmatprep.subr.bf16.mxu0 %v1663_v1  ;;  %1383 = vmatprep.subr.bf16.mxu1 %v1663_v1 }
  0x2d   : > { %560 = vmatpush1.bf16.msra.mxu0 %v1476_v10  ;;  %1393 = vmatpush1.bf16.msra.mxu1 %v1476_v10 }
  0x2e   : > { %561 = vmatprep.subr.bf16.mxu0 %v1663_v1  ;;  %1384 = vmatprep.subr.bf16.mxu1 %v1663_v1 }
  0x31   : > { %562 = vmatpush1.bf16.msra.mxu0 %v1477_v11  ;;  %1394 = vmatpush1.bf16.msra.mxu1 %v1477_v11 }
  0x32   : > { %563 = vmatprep.subr.bf16.mxu0 %v1663_v1  ;;  %1385 = vmatprep.subr.bf16.mxu1 %v1663_v1 }
  0x35   : > { %564 = vmatpush1.bf16.msra.mxu0 %v1478_v12  ;;  %1395 = vmatpush1.bf16.msra.mxu1 %v1478_v12 }
  0x38   : > { %578 = vmatmul.mubr.bf16.vlgmr.msra.gmra.mrb[0].mxu0 %v1479_v13  ;;  %642 = vmatmul.mubr.bf16.vlgmr.msra.gmra.mrb[0].mxu1 %v1482_v14 }
  0x39   : > { %1190 = vmatprep.mubr.msk.bf16.mxu0 %vm496_vm0, %v1485_v15  ;;  %1198 = vmatprep.mubr.msk.bf16.mxu1 %vm496_vm0, %v1487_v16 }
  0x40   : > { %586 = vmatmul.mubr.bf16.gmra.mrb[4].mxu0 %v1489_v17  ;;  %650 = vmatmul.mubr.bf16.gmra.mrb[4].mxu1 %v1490_v18 }
  0x41   : > { %1191 = vmatprep.mubr.msk.bf16.mxu0 %vm496_vm0, %v1491_v19  ;;  %1199 = vmatprep.mubr.msk.bf16.mxu1 %vm496_vm0, %v1493_v20 }
  0x48   : > { %594 = vmatmul.mubr.bf16.gmra.mrb[8].mxu0 %v1495_v21  ;;  %658 = vmatmul.mubr.bf16.gmra.mrb[8].mxu1 %v1496_v22 }
  0x49   : > { %1192 = vmatprep.mubr.msk.bf16.mxu0 %vm496_vm0, %v1497_v23  ;;  %1200 = vmatprep.mubr.msk.bf16.mxu1 %vm496_vm0, %v1499_v24 }
  0x50   : > { %602 = vmatmul.mubr.bf16.gmra.mrb[12].mxu0 %v1501_v25  ;;  %666 = vmatmul.mubr.bf16.gmra.mrb[12].mxu1 %v1502_v26 }
  0x51   : > { %1193 = vmatprep.mubr.msk.bf16.mxu0 %vm496_vm0, %v1503_v27  ;;  %1201 = vmatprep.mubr.msk.bf16.mxu1 %vm496_vm0, %v1505_v28 }
  0x58   : > { %610 = vmatmul.mubr.bf16.gmra.mrb[16].mxu0 %v1507_v29  ;;  %674 = vmatmul.mubr.bf16.gmra.mrb[16].mxu1 %v1508_v30 }
  0x59   : > { %1194 = vmatprep.mubr.msk.bf16.mxu0 %vm496_vm0, %v1509_v31  ;;  %1202 = vmatprep.mubr.msk.bf16.mxu1 %vm496_vm0, %v1511_v32 }
  0x60   : > { %618 = vmatmul.mubr.bf16.gmra.mrb[20].mxu0 %v1513_v33  ;;  %682 = vmatmul.mubr.bf16.gmra.mrb[20].mxu1 %v1514_v34 }
  0x61   : > { %1195 = vmatprep.mubr.msk.bf16.mxu0 %vm496_vm0, %v1515_v35  ;;  %1203 = vmatprep.mubr.msk.bf16.mxu1 %vm496_vm0, %v1517_v36 }
  0x68   : > { %626 = vmatmul.mubr.bf16.gmra.mrb[24].mxu0 %v1519_v37  ;;  %690 = vmatmul.mubr.bf16.gmra.mrb[24].mxu1 %v1520_v38 }
  0x69   : > { %1196 = vmatprep.mubr.msk.bf16.mxu0 %vm496_vm0, %v1521_v39  ;;  %1204 = vmatprep.mubr.msk.bf16.mxu1 %vm496_vm0, %v1523_v40 }
  0x70   : > { %634 = vmatmul.mubr.bf16.gmra.mrb[28].mxu0 %v1525_v41  ;;  %698 = vmatmul.mubr.bf16.gmra.mrb[28].mxu1 %v1526_v42 }
 0x10b   : > { %v1843_v43 = vpop.f32.mrb[0].mxu0  ;;  %v1845_v44 = vpop.f32.mrb[0].mxu1 }
 0x10c   : > { %v581_v45 = vpop.f32.mrb[1].mxu0  ;;  %v645_v46 = vpop.f32.mrb[1].mxu1 }
 0x10d   : > { %v1847_v47 = vpop.f32.mrb[2].mxu0  ;;  %v1849_v48 = vpop.f32.mrb[2].mxu1 }
 0x10e   : > { %v1284_v49 = vpack.c.bf16 %v1847_v47, %v1843_v43  ;;  %v1324_v50 = vpack.c.bf16 %v1849_v48, %v1845_v44  ;;  %v584_v51 = vpop.f32.mrb[3].mxu0  ;;  %v648_v52 = vpop.f32.mrb[3].mxu1 }
 0x110   : > { %1285 = vst [vmem:[%s1855_s14] sm:$0xff] %v1284_v49   ;;  %1368 = vst [vmem:[%s1855_s14 + $0x40] sm:$0xff] %v1324_v50  }
 0x113   : > { %v1859_v53 = vpop.f32.mrb[4].mxu0  ;;  %v1861_v54 = vpop.f32.mrb[4].mxu1 }
 0x114   : > { %v589_v55 = vpop.f32.mrb[5].mxu0  ;;  %v653_v56 = vpop.f32.mrb[5].mxu1 }
 0x115   : > { %v1863_v57 = vpop.f32.mrb[6].mxu0  ;;  %v1865_v58 = vpop.f32.mrb[6].mxu1 }
 0x116   : > { %v1289_v59 = vpack.c.bf16 %v1863_v57, %v1859_v53  ;;  %v1329_v60 = vpack.c.bf16 %v1865_v58, %v1861_v54  ;;  %v592_v61 = vpop.f32.mrb[7].mxu0  ;;  %v656_v62 = vpop.f32.mrb[7].mxu1 }
 0x118   : > { %1361 = vst [vmem:[%s1855_s14 + $0x8] sm:$0xff] %v1289_v59   ;;  %1369 = vst [vmem:[%s1855_s14 + $0x48] sm:$0xff] %v1329_v60  }
 0x11b   : > { %v1873_v63 = vpop.f32.mrb[8].mxu0  ;;  %v1875_v0 = vpop.f32.mrb[8].mxu1 }
 0x11c   : > { %v597_v1 = vpop.f32.mrb[9].mxu0  ;;  %v661_v2 = vpop.f32.mrb[9].mxu1 }
 0x11d   : > { %v1877_v3 = vpop.f32.mrb[10].mxu0  ;;  %v1879_v4 = vpop.f32.mrb[10].mxu1 }
 0x11e   : > { %v1294_v5 = vpack.c.bf16 %v1877_v3, %v1873_v63  ;;  %v1334_v6 = vpack.c.bf16 %v1879_v4, %v1875_v0  ;;  %v600_v7 = vpop.f32.mrb[11].mxu0  ;;  %v664_v8 = vpop.f32.mrb[11].mxu1 }
 0x11f   : > { %v1664_v7 = vmov (!%p1237_p12), 0.0  }
 0x120   : > { %1362 = vst [vmem:[%s1855_s14 + $0x10] sm:$0xff] %v1294_v5   ;;  %1370 = vst [vmem:[%s1855_s14 + $0x50] sm:$0xff] %v1334_v6  }
 0x121   : > { %870 = vst [vmem:[#allocation4] sm:$0x1] (!%p1237_p12), %v1664_v7  ;;  %871 = vst [vmem:[#allocation6] sm:$0x1] (!%p1237_p12), %v1664_v7 }
 0x123   : > { %v1887_v9 = vpop.f32.mrb[12].mxu0  ;;  %v1889_v10 = vpop.f32.mrb[12].mxu1 }
 0x124   : > { %v605_v11 = vpop.f32.mrb[13].mxu0  ;;  %v669_v12 = vpop.f32.mrb[13].mxu1 }
 0x125   : > { %v1891_v13 = vpop.f32.mrb[14].mxu0  ;;  %v1893_v14 = vpop.f32.mrb[14].mxu1 }
 0x126   : > { %v1299_v15 = vpack.c.bf16 %v1891_v13, %v1887_v9  ;;  %v1339_v16 = vpack.c.bf16 %v1893_v14, %v1889_v10  ;;  %v608_v17 = vpop.f32.mrb[15].mxu0  ;;  %v672_v18 = vpop.f32.mrb[15].mxu1 }
 0x128   : > { %1363 = vst [vmem:[%s1855_s14 + $0x18] sm:$0xff] %v1299_v15   ;;  %1371 = vst [vmem:[%s1855_s14 + $0x58] sm:$0xff] %v1339_v16  }
 0x12b   : > { %v1901_v19 = vpop.f32.mrb[16].mxu0  ;;  %v1903_v20 = vpop.f32.mrb[16].mxu1 }
 0x12c   : > { %v613_v21 = vpop.f32.mrb[17].mxu0  ;;  %v677_v22 = vpop.f32.mrb[17].mxu1 }
 0x12d   : > { %v1905_v23 = vpop.f32.mrb[18].mxu0  ;;  %v1907_v24 = vpop.f32.mrb[18].mxu1 }
 0x12e   : > { %v1304_v25 = vpack.c.bf16 %v1905_v23, %v1901_v19  ;;  %v1344_v26 = vpack.c.bf16 %v1907_v24, %v1903_v20  ;;  %v616_v27 = vpop.f32.mrb[19].mxu0  ;;  %v680_v28 = vpop.f32.mrb[19].mxu1 }
 0x130   : > { %1364 = vst [vmem:[%s1855_s14 + $0x20] sm:$0xff] %v1304_v25   ;;  %1372 = vst [vmem:[%s1855_s14 + $0x60] sm:$0xff] %v1344_v26  }
 0x133   : > { %v1915_v29 = vpop.f32.mrb[20].mxu0  ;;  %v1917_v30 = vpop.f32.mrb[20].mxu1 }
 0x134   : > { %v621_v31 = vpop.f32.mrb[21].mxu0  ;;  %v685_v32 = vpop.f32.mrb[21].mxu1 }
 0x135   : > { %v1919_v33 = vpop.f32.mrb[22].mxu0  ;;  %v1921_v34 = vpop.f32.mrb[22].mxu1 }
 0x136   : > { %v1309_v35 = vpack.c.bf16 %v1919_v33, %v1915_v29  ;;  %v1349_v36 = vpack.c.bf16 %v1921_v34, %v1917_v30  ;;  %v624_v37 = vpop.f32.mrb[23].mxu0  ;;  %v688_v38 = vpop.f32.mrb[23].mxu1 }
 0x138   : > { %1365 = vst [vmem:[%s1855_s14 + $0x28] sm:$0xff] %v1309_v35   ;;  %1373 = vst [vmem:[%s1855_s14 + $0x68] sm:$0xff] %v1349_v36  }
 0x13b   : > { %v1929_v39 = vpop.f32.mrb[24].mxu0  ;;  %v1931_v40 = vpop.f32.mrb[24].mxu1 }
 0x13c   : > { %v629_v41 = vpop.f32.mrb[25].mxu0  ;;  %v693_v42 = vpop.f32.mrb[25].mxu1 }
 0x13d   : > { %v1933_v45 = vpop.f32.mrb[26].mxu0  ;;  %v1935_v46 = vpop.f32.mrb[26].mxu1 }
 0x13e   : > { %v1314_v49 = vpack.c.bf16 %v1933_v45, %v1929_v39  ;;  %v1354_v50 = vpack.c.bf16 %v1935_v46, %v1931_v40  ;;  %v632_v51 = vpop.f32.mrb[27].mxu0  ;;  %v696_v52 = vpop.f32.mrb[27].mxu1 }
 0x140   : > { %1366 = vst [vmem:[%s1855_s14 + $0x30] sm:$0xff] %v1314_v49   ;;  %1374 = vst [vmem:[%s1855_s14 + $0x70] sm:$0xff] %v1354_v50  }
 0x142   : > { %869 = sbr.rel (%p1237_p12) target bundleno = 329 (0x149), region = 32 }
 0x143   : > { %v1943_v55 = vpop.f32.mrb[28].mxu0  ;;  %v1945_v56 = vpop.f32.mrb[28].mxu1 }
 0x144   : > { %v637_v59 = vpop.f32.mrb[29].mxu0  ;;  %v701_v60 = vpop.f32.mrb[29].mxu1 }
 0x145   : > { %v1947_v61 = vpop.f32.mrb[30].mxu0  ;;  %v1949_v62 = vpop.f32.mrb[30].mxu1 }
 0x146   : > { %v1319_v1 = vpack.c.bf16 %v1947_v61, %v1943_v55  ;;  %v1359_v2 = vpack.c.bf16 %v1949_v62, %v1945_v56  ;;  %v640_v5 = vpop.f32.mrb[31].mxu0  ;;  %v704_v6 = vpop.f32.mrb[31].mxu1 }
 0x148   : > { %1367 = vst [vmem:[%s1855_s14 + $0x38] sm:$0xff] %v1319_v1   ;;  %1375 = vst [vmem:[%s1855_s14 + $0x78] sm:$0xff] %v1359_v2  }
 0x149 PF: > { %v873_v8 = vadd.f32 %v1847_v47, %v1843_v43  ;;  %s1280_s24 = sshll.u32 %s1653_s18, 11  ;;  %s999_s6 = sshll.u32 %s1855_s14, 4  ;;  %v913_v15 = vmul.f32 %v1843_v43, %v1843_v43  ;;  %v914_v16 = vmul.f32 %v1847_v47, %v1847_v47  ;;  %s1969_s6 = int_to_ptr.vmem [resolvable:$true] %s999_s6 }
 0x14a   : > { %s1965_s5 = scalar_lea.hbm %s2153_s2, %s1280_s24  ;;  %s1978_s18 = scalar_lea.sflag [#allocation3], %s220_s21 }
 0x14b   : > { %v874_v11 = vadd.f32 %v873_v8, %v1859_v53  ;;  %s1527_s7 = scalar_lea.vmem %s1969_s6, 2048  ;;  %s1665_s8 = smov [#allocation2]  }
 0x14c   : > { %p1528_p13 = scmp.ne.s32.totalorder %s1969_s6, %s1527_s7  ;;  %s1531_s9 = sshll.u32 %s1665_s8, 4  ;;  %s1532_s9 = int_to_ptr.vmem [resolvable:$false] %s1531_s9 }
 0x14d   : > { %v875_v12 = vadd.f32 %v874_v11, %v1863_v57  ;;  %s1533_s10 = scalar_lea.vmem %s1532_s9, 4096  ;;  %p1534_p3 = scmp.lt.s32.totalorder %s1969_s6, %s1532_s9 }
 0x14e   : > { %p1529_p0 = pnand %p1528_p13, %p1741_p4  ;;  %p1535_p5 = scmp.lt.s32.totalorder %s1533_s10, %s1527_s7 }
 0x14f   : > { %v876_v17 = vadd.f32 %v875_v12, %v1873_v63 }
 0x150   : > { %p1530_p1 = pneg %p1529_p0  ;;  %p1536_p6 = por %p1535_p5, %p1534_p3 }
 0x152   : > { %p1537_p7 = pnand %p1536_p6, %p1530_p1 }
 0x154   : > { %1540 = shalt.err (!%p1537_p7)
}
 0x155   : > { %s1541_s11 = scalar_lea.hbm %s1965_s5, 2048  ;;  %s1545_s21 = scalar_lea.hbm %s2153_s2, 4096 }
 0x156   : > { %p1542_p9 = scmp.ne.s32.totalorder %s1965_s5, %s1541_s11  ;;  %p1546_p12 = scmp.lt.u32.totalorder %s1965_s5, %s2153_s2 }
 0x157   : > { %p1547_p13 = scmp.lt.u32.totalorder %s1545_s21, %s1541_s11  ;;  %p1549_p1 = scmp.lt.u32.totalorder %s1541_s11, %s1965_s5 }
 0x158   : > { %p1543_p10 = pnand %p1542_p9, %p1741_p4 }
 0x159   : > { %p1548_p0 = por %p1547_p13, %p1546_p12 }
 0x15a   : > { %p1544_p11 = pneg %p1543_p10 }
 0x15b   : > { %p1550_p3 = por %p1549_p1, %p1548_p0 }
 0x15d   : > { %p1551_p5 = pnand %p1550_p3, %p1544_p11 }
 0x15f   : > { %1554 = shalt.err (!%p1551_p5)
}
 0x160   : > { %s1666_s24 = smov 64   ;;  %s1667_s27 = smov 4   ;;  %v915_v43 = vmul.f32 %v1859_v53, %v1859_v53  ;;  %v877_v47 = vadd.f32 %v876_v17, %v1877_v3  ;;  %v916_v18 = vmul.f32 %v1863_v57, %v1863_v57  ;;  %v945_v21 = vadd.f32 %v914_v16, %v913_v15 }
 0x161   : > { %1396 = dma.vmem_to_hbm [thread:$0]  (%p1741_p4), %s1969_s6, 2048, %s1965_s5, %s1978_s18, %s1666_s24, %s1666_s24, %s1667_s27   ;;  %v917_v25 = vmul.f32 %v1873_v63, %v1873_v63  ;;  %v918_v28 = vmul.f32 %v1877_v3, %v1877_v3  ;;  %v919_v32 = vmul.f32 %v1887_v9, %v1887_v9  ;;  %v920_v36 = vmul.f32 %v1891_v13, %v1891_v13 }
 0x162   : > { %v878_v22 = vadd.f32 %v877_v47, %v1887_v9  ;;  %v946_v26 = vadd.f32 %v945_v21, %v915_v43  ;;  %v921_v38 = vmul.f32 %v1901_v19, %v1901_v19  ;;  %v922_v42 = vmul.f32 %v1905_v23, %v1905_v23  ;;  %s1668_s26 = smov [#allocation4]  }
 0x163   : > { %v923_v50 = vmul.f32 %v1915_v29, %v1915_v29  ;;  %v924_v52 = vmul.f32 %v1919_v33, %v1919_v33  ;;  %v925_v60 = vmul.f32 %v1929_v39, %v1929_v39  ;;  %v926_v2 = vmul.f32 %v1933_v45, %v1933_v45  ;;  %s1015_s30 = sshll.u32 %s1668_s26, 4  ;;  %s1016_s30 = int_to_ptr.vmem [resolvable:$true] %s1015_s30 }
 0x164   : > { %v879_v27 = vadd.f32 %v878_v22, %v1891_v13  ;;  %v947_v31 = vadd.f32 %v946_v26, %v916_v18  ;;  %v927_v6 = vmul.f32 %v1943_v55, %v1943_v55  ;;  %v928_v8 = vmul.f32 %v1947_v61, %v1947_v61  ;;  %s1555_s5 = scalar_lea.vmem %s1016_s30, 16  ;;  %s1561_s6 = scalar_lea.vmem %s1016_s30, 32 }
 0x165   : > { %v929_v12 = vmul.f32 %v1845_v44, %v1845_v44  ;;  %v930_v16 = vmul.f32 %v1849_v48, %v1849_v48  ;;  %v931_v43 = vmul.f32 %v1861_v54, %v1861_v54  ;;  %v932_v18 = vmul.f32 %v1865_v58, %v1865_v58  ;;  %p1556_p4 = scmp.ne.s32.totalorder %s1016_s30, %s1555_s5  ;;  %p1562_p9 = scmp.lt.s32.totalorder %s1016_s30, %s1016_s30 }
 0x166   : > { %v880_v53 = vadd.f32 %v879_v27, %v1901_v19  ;;  %v948_v35 = vadd.f32 %v947_v31, %v917_v25  ;;  %v933_v22 = vmul.f32 %v1875_v0, %v1875_v0  ;;  %v934_v26 = vmul.f32 %v1879_v4, %v1879_v4  ;;  %p1563_p10 = scmp.lt.s32.totalorder %s1561_s6, %s1555_s5 }
 0x167   : > { %p1557_p6 = pnand %p1556_p4, %p1731_p2 }
 0x168   : > { %v881_v57 = vadd.f32 %v880_v53, %v1905_v23  ;;  %v949_v37 = vadd.f32 %v948_v35, %v918_v28  ;;  %v935_v28 = vmul.f32 %v1889_v10, %v1889_v10  ;;  %v936_v53 = vmul.f32 %v1893_v14, %v1893_v14  ;;  %p1564_p11 = por %p1563_p10, %p1562_p9 }
 0x169   : > { %v937_v35 = vmul.f32 %v1903_v20, %v1903_v20  ;;  %p1558_p7 = pneg %p1557_p6 }
 0x16a   : > { %v882_v63 = vadd.f32 %v881_v57, %v1915_v29  ;;  %v950_v41 = vadd.f32 %v949_v37, %v919_v32 }
 0x16b   : > { %p1565_p12 = pnand %p1564_p11, %p1558_p7 }
 0x16c   : > { %v883_v3 = vadd.f32 %v882_v63, %v1919_v33  ;;  %v951_v49 = vadd.f32 %v950_v41, %v920_v36  ;;  %v938_v36 = vmul.f32 %v1907_v24, %v1907_v24  ;;  %v939_v63 = vmul.f32 %v1917_v30, %v1917_v30 }
 0x16d   : > { %v940_v41 = vmul.f32 %v1921_v34, %v1921_v34 }
 0x16e   : > { %v884_v9 = vadd.f32 %v883_v3, %v1929_v39  ;;  %v952_v51 = vadd.f32 %v951_v49, %v921_v38 }
 0x170   : > { %v885_v13 = vadd.f32 %v884_v9, %v1933_v45  ;;  %v953_v59 = vadd.f32 %v952_v51, %v922_v42  ;;  %v941_v42 = vmul.f32 %v1931_v40, %v1931_v40  ;;  %v942_v9 = vmul.f32 %v1935_v46, %v1935_v46 }
 0x171   : > { %v943_v51 = vmul.f32 %v1945_v56, %v1945_v56 }
 0x172   : > { %v886_v19 = vadd.f32 %v885_v13, %v1943_v55  ;;  %v954_v1 = vadd.f32 %v953_v59, %v923_v50 }
 0x174   : > { %v887_v23 = vadd.f32 %v886_v19, %v1947_v61  ;;  %v955_v5 = vadd.f32 %v954_v1, %v924_v52 }
 0x176   : > { %v888_v29 = vadd.f32 %v887_v23, %v1845_v44  ;;  %v956_v7 = vadd.f32 %v955_v5, %v925_v60 }
 0x178   : > { %v889_v33 = vadd.f32 %v888_v29, %v1849_v48  ;;  %v957_v11 = vadd.f32 %v956_v7, %v926_v2  ;;  %v872_v2 = vld [vmem:[#allocation4] sm:$0x1] }
 0x17a   : > { %v890_v39 = vadd.f32 %v889_v33, %v1861_v54  ;;  %v958_v15 = vadd.f32 %v957_v11, %v927_v6 }
 0x17c   : > { %v891_v45 = vadd.f32 %v890_v39, %v1865_v58  ;;  %v959_v17 = vadd.f32 %v958_v15, %v928_v8 }
 0x17e   : > { %v892_v55 = vadd.f32 %v891_v45, %v1875_v0  ;;  %v960_v47 = vadd.f32 %v959_v17, %v929_v12 }
 0x180   : > { %v893_v61 = vadd.f32 %v892_v55, %v1879_v4  ;;  %v961_v21 = vadd.f32 %v960_v47, %v930_v16 }
 0x182   : > { %v894_v44 = vadd.f32 %v893_v61, %v1889_v10  ;;  %v962_v25 = vadd.f32 %v961_v21, %v931_v43 }
 0x184   : > { %v895_v48 = vadd.f32 %v894_v44, %v1893_v14  ;;  %v963_v27 = vadd.f32 %v962_v25, %v932_v18 }
 0x186   : > { %v896_v54 = vadd.f32 %v895_v48, %v1903_v20  ;;  %v964_v31 = vadd.f32 %v963_v27, %v933_v22 }
 0x188   : > { %v897_v58 = vadd.f32 %v896_v54, %v1907_v24  ;;  %v965_v32 = vadd.f32 %v964_v31, %v934_v26 }
 0x18a   : > { %v898_v0 = vadd.f32 %v897_v58, %v1917_v30  ;;  %v966_v57 = vadd.f32 %v965_v32, %v935_v28 }
 0x18c   : > { %v899_v4 = vadd.f32 %v898_v0, %v1921_v34  ;;  %v967_v37 = vadd.f32 %v966_v57, %v936_v53  ;;  %v944_v34 = vmul.f32 %v1949_v62, %v1949_v62 }
 0x18e   : > { %v900_v10 = vadd.f32 %v899_v4, %v1931_v40  ;;  %v968_v38 = vadd.f32 %v967_v37, %v937_v35 }
 0x190   : > { %v901_v14 = vadd.f32 %v900_v10, %v1935_v46  ;;  %v969_v3 = vadd.f32 %v968_v38, %v938_v36 }
 0x192   : > { %v902_v20 = vadd.f32 %v901_v14, %v1945_v56  ;;  %v970_v49 = vadd.f32 %v969_v3, %v939_v63 }
 0x194   : > { %v903_v24 = vadd.f32 %v902_v20, %v1949_v62  ;;  %v971_v50 = vadd.f32 %v970_v49, %v940_v41 }
 0x196   : > { %v904_v30 = vrot.slane %v903_v24, 4  ;;  %v972_v13 = vadd.f32 %v971_v50, %v941_v42 }
 0x198   : > { %v905_v52 = vadd.f32 %v904_v30, %v903_v24  ;;  %v973_v59 = vadd.f32 %v972_v13, %v942_v9 }
 0x19a   : > { %v906_v19 = vrot.slane %v905_v52, 2  ;;  %v974_v60 = vadd.f32 %v973_v59, %v943_v51 }
 0x19c   : > { %v907_v40 = vadd.f32 %v906_v19, %v905_v52  ;;  %v975_v1 = vadd.f32 %v974_v60, %v944_v34 }
 0x19e   : > { %v908_v23 = vrot.slane %v907_v40, 1  ;;  %v976_v5 = vrot.slane %v975_v1, 4 }
 0x1a0   : > { %v909_v46 = vadd.f32 %v908_v23, %v907_v40  ;;  %v977_v29 = vadd.f32 %v976_v5, %v975_v1 }
 0x1a2   : > { %v910_v6 = vadd.f32 %v909_v46, %v872_v2  ;;  %v978_v56 = vrot.slane %v977_v29, 2 }
 0x1a4   : > { %911 = vst [vmem:[#allocation4] sm:$0x1] %v910_v6  ;;  %v979_v7 = vadd.f32 %v978_v56, %v977_v29 }
 0x1a5   : > { %1568 = shalt.err (!%p1565_p12)
}
 0x1a6   : > { %s1569_s8 = scalar_lea.hbm %s2154_s3, 16 }
 0x1a7   : > { %p1570_p13 = scmp.ne.s32.totalorder %s2154_s3, %s1569_s8  ;;  %p1575_p3 = scmp.lt.u32.totalorder %s1569_s8, %s2154_s3 }
 0x1a9   : > { %p1571_p0 = pnand %p1570_p13, %p1731_p2 }
 0x1ab   : > { %p1572_p1 = pneg %p1571_p0 }
 0x1ad   : > { %p1577_p5 = pnand %p1575_p3, %p1572_p1 }
 0x1af   : > { %1580 = shalt.err (!%p1577_p5)
}
 0x1b0   : > { %1398 = dma.vmem_to_hbm [thread:$0]  (%p1731_p2), %s1016_s30, 16, %s2154_s3, [#allocation5]   ;;  %v980_v62 = vrot.slane %v979_v7, 1  ;;  %v912_v33 = vld [vmem:[#allocation6] sm:$0x1] }
 0x1b1   : > { %s1669_s22 = smov [#allocation6]  }
 0x1b2   : > { %s1028_s14 = sshll.u32 %s1669_s22, 4  ;;  %v981_v8 = vadd.f32 %v980_v62, %v979_v7  ;;  %s1029_s14 = int_to_ptr.vmem [resolvable:$true] %s1028_s14 }
 0x1b3   : > { %s1581_s24 = scalar_lea.vmem %s1029_s14, 16  ;;  %s1587_s27 = scalar_lea.vmem %s1029_s14, 32 }
 0x1b4   : > { %v982_v11 = vadd.f32 %v981_v8, %v912_v33  ;;  %p1582_p4 = scmp.ne.s32.totalorder %s1029_s14, %s1581_s24  ;;  %p1588_p9 = scmp.lt.s32.totalorder %s1029_s14, %s1029_s14 }
 0x1b5   : > { %p1589_p10 = scmp.lt.s32.totalorder %s1587_s27, %s1581_s24 }
 0x1b6   : > { %983 = vst [vmem:[#allocation6] sm:$0x1] %v982_v11  ;;  %p1583_p6 = pnand %p1582_p4, %p1731_p2 }
 0x1b7   : > { %p1590_p11 = por %p1589_p10, %p1588_p9 }
 0x1b8   : > { %p1584_p7 = pneg %p1583_p6 }
 0x1ba   : > { %p1591_p12 = pnand %p1590_p11, %p1584_p7 }
 0x1bc   : > { %1594 = shalt.err (!%p1591_p12)
}
 0x1bd   : > { %s1595_s5 = scalar_lea.hbm %s2155_s4, 16 }
 0x1be   : > { %p1596_p13 = scmp.ne.s32.totalorder %s2155_s4, %s1595_s5  ;;  %p1601_p3 = scmp.lt.u32.totalorder %s1595_s5, %s2155_s4 }
 0x1c0   : > { %p1597_p0 = pnand %p1596_p13, %p1731_p2 }
 0x1c2   : > { %p1598_p1 = pneg %p1597_p0 }
 0x1c4   : > { %p1603_p5 = pnand %p1601_p3, %p1598_p1 }
 0x1c6   : > { %1606 = shalt.err (!%p1603_p5)
}
 0x1c7   : > { %1400 = dma.vmem_to_hbm [thread:$0]  (%p1731_p2), %s1029_s14, 16, %s2155_s4, [#allocation5]  }
 0x1c8   : > { %1632 = dma.done.wait (%p1731_p2), [#allocation5], 32  }
 0x1c9   : > { %1634 = vsyncadd (%p1731_p2), [#allocation5], 4294967264 }
 0x1ca PF: > { %p1414_p4 = scmp.ge.s32.totalorder %s1661_s20, 2  ;;  %s1048_s11 = sand.u32 1, %s1641_s15  }
 0x1cb   : > { %s1049_s12 = scalar_lea.sflag [#allocation3], %s1048_s11 }
 0x1cc   : > { %p1407_p6 = pnand %p1414_p4, %p1748_p8 }
 0x1ce   : > { %1636 = dma.done.wait (!%p1407_p6), %s1049_s12, 2048  }
 0x1cf   : > { %1638 = vsyncadd (!%p1407_p6), %s1049_s12, 4294965248  ;;  %s19_s20 = sadd.s32 1, %s1661_s20   ;;  %s2159_s15 = smov %s1645_s16 }
 0x1d0   : > { %p16_p7 = scmp.ge.s32.totalorder %s19_s20, 4   ;;  %s2160_s16 = smov %s1649_s17 }
 0x1d1   : > { %s2161_s17 = smov %s1754_s29  ;;  %s2162_s18 = smov %s1657_s19 }
 0x1d2   : > { %s2163_s19 = smov %s2165_s23  ;;  %18 = sbr.rel (!%p16_p7) target bundleno = 5 (0x5), region = 88 }
 0x1d9   :  { %1054 = vsyncpa [#allocation3], 1 }
 0x1da   :  { %1056 = vsyncpa [#allocation3 + $0x1], 1 }
 0x1db   :  { %1057 = vsyncpa [#allocation5], 1 }

</bundles_post_ra>
